<compile_context>
chip_gen: v7x
topology: tpu7x:2x2x1
jax: 0.10.0
libtpu: 0.0.40
codegen_flags: <defaults>
</compile_context>

<pallas_src>
import jax
import jax.numpy as jnp
from jax.experimental import pallas as pl
from jax.experimental.pallas import tpu as pltpu

latent_size = 11

_LANE = 128      # vreg lane width (last dim)
_SUBLANE = 8     # vreg sublane count (second-to-last dim, f32)


def _round_up(x, m):
    return ((x + m - 1) // m) * m


def generator_kernel(z_ref, w1_ref, b1_ref, w2_ref, b2_ref, out_ref):
    # Hidden layer: z @ W1 + b1 -> ReLU  (MXU matmul, f32 accumulation).
    h = jnp.dot(z_ref[...], w1_ref[...], preferred_element_type=jnp.float32)
    h = jnp.maximum(h + b1_ref[...], 0.0)            # b1 is (1, H_p), broadcasts

    # Output layer: h @ W2 + b2 -> Sigmoid (exp lowers to the EUP slot).
    y = jnp.dot(h, w2_ref[...], preferred_element_type=jnp.float32)
    out_ref[...] = jax.nn.sigmoid(y + b2_ref[...]).astype(out_ref.dtype)


def prepare_generator_params(w1, b1, w2, b2):
    """One-time layout prep (call at init, NOT per forward).

    Pads the hidden dim H up to a lane multiple (128). Zero padding is exact:
    ReLU(0 + 0) = 0 for padded hidden columns and zero W2 rows contribute
    nothing to the output. The output dim D is left unpadded (full-dim block).
    Weights are stored (in, out) — already transposed vs PyTorch's (out, in).
    """
    H = w1.shape[1]
    H_p = _round_up(H, _LANE)
    w1_p = jnp.pad(w1, ((0, 0), (0, H_p - H)))
    b1_p = jnp.pad(b1, ((0, 0), (0, H_p - H)))
    w2_p = jnp.pad(w2, ((0, H_p - H), (0, 0)))
    return w1_p, b1_p, w2_p, b2


@jax.jit
def generator_forward(z, w1_p, b1_p, w2_p, b2):
    """z: (B, K), w1_p: (K, H_p), b1_p: (1, H_p), w2_p: (H_p, D), b2: (1, D).

    Returns (B, D). Parameters must come from `prepare_generator_params`.
    """
    B, K = z.shape
    H_p = w1_p.shape[1]
    D = w2_p.shape[1]

    # Batch tiling: tiles are multiples of 8 sublanes, capped near 256 rows so
    # the (tm, H_p) f32 intermediate stays well inside vregs/VMEM, padding
    # waste is bounded to a few sublane groups, and for B >= 16 we force at
    # least 2 grid steps so the "parallel" batch axis can use both v7x TCs.
    B_p8 = _round_up(B, _SUBLANE)
    n_tiles = max(pl.cdiv(B_p8, 256), 2 if B >= 16 else 1)
    tm = _round_up(pl.cdiv(B_p8, n_tiles), _SUBLANE)
    B_pad = tm * n_tiles

    z_p = z if B_pad == B else jnp.pad(z, ((0, B_pad - B), (0, 0)))

    flops = 2 * B_pad * (K * H_p + H_p * D)
    bytes_accessed = 4 * (z_p.size + w1_p.size + b1_p.size
                          + w2_p.size + b2.size + B_pad * D)
    cost = pl.CostEstimate(flops=flops,
                           transcendentals=B_pad * D,
                           bytes_accessed=bytes_accessed)

    out = pl.pallas_call(
        generator_kernel,
        out_shape=jax.ShapeDtypeStruct((B_pad, D), jnp.float32),
        grid_spec=pltpu.PrefetchScalarGridSpec(
            num_scalar_prefetch=0,
            grid=(n_tiles,),
            in_specs=[
                # Activations: tiled over the batch grid axis (double-buffered).
                pl.BlockSpec((tm, K), lambda i: (i, 0)),
                # Weights / biases: same block every step -> VMEM-resident.
                pl.BlockSpec((K, H_p), lambda i: (0, 0)),
                pl.BlockSpec((1, H_p), lambda i: (0, 0)),
                pl.BlockSpec((H_p, D), lambda i: (0, 0)),
                pl.BlockSpec((1, D), lambda i: (0, 0)),
            ],
            out_specs=pl.BlockSpec((tm, D), lambda i: (i, 0)),
        ),
        compiler_params=pltpu.CompilerParams(
            # Batch rows are independent -> shard across v7x's two TCs.
            dimension_semantics=("parallel",),
        ),
        cost_estimate=cost,
    )(z_p, w1_p, b1_p, w2_p, b2)

    return out if B_pad == B else out[:B]


def init_linear_params(key, fan_in, fan_out):
    """Deterministic init mimicking nn.Linear: U(-1/sqrt(fan_in), 1/sqrt(fan_in)).

    Returns weight with shape (fan_in, fan_out) (already transposed vs PyTorch)
    and bias with shape (1, fan_out).
    """
    kw, kb = jax.random.split(key)
    bound = 1.0 / jnp.sqrt(jnp.asarray(fan_in, dtype=jnp.float32))
    w = jax.random.uniform(kw, (fan_in, fan_out), jnp.float32, -bound, bound)
    b = jax.random.uniform(kb, (1, fan_out), jnp.float32, -bound, bound)
    return w, b


if __name__ == "__main__":
    # Small shapes consistent with the module: Generator(latent_size=11, H=32, D_in=64)
    B, H, D_in = 8, 32, 64

    key = jax.random.PRNGKey(0)
    k_z, k_l1, k_l2 = jax.random.split(key, 3)

    z = jax.random.normal(k_z, (B, latent_size), dtype=jnp.float32)
    w1, b1 = init_linear_params(k_l1, latent_size, H)
    w2, b2 = init_linear_params(k_l2, H, D_in)

    # One-time layout prep (hoisted out of the per-call forward).
    w1_p, b1_p, w2_p, b2_p = prepare_generator_params(w1, b1, w2, b2)
    w1_p, b1_p, w2_p, b2_p = jax.block_until_ready((w1_p, b1_p, w2_p, b2_p))

    img = generator_forward(z, w1_p, b1_p, w2_p, b2_p)
    jax.block_until_ready(img)

    # Reference check against plain JAX (same math as the PyTorch module).
    ref = jax.nn.sigmoid(jnp.maximum(z @ w1 + b1, 0.0) @ w2 + b2)
    assert img.shape == (B, D_in)
    assert jnp.allclose(img, ref, atol=1e-5, rtol=1e-5)

    print("KERNEL_OK")
</pallas_src>

<mosaic_0001>
module attributes {stable_mosaic.version = 11 : i64} {
  func.func @generator_kernel(%arg0: i32, %arg1: memref<8x11xf32, #tpu.memory_space<vmem>>, %arg2: memref<11x128xf32, #tpu.memory_space<vmem>>, %arg3: memref<1x128xf32, #tpu.memory_space<vmem>>, %arg4: memref<128x64xf32, #tpu.memory_space<vmem>>, %arg5: memref<1x64xf32, #tpu.memory_space<vmem>>, %arg6: memref<8x64xf32, #tpu.memory_space<vmem>>) attributes {dimension_semantics = [#tpu.dimension_semantics<parallel>], iteration_bounds = array<i64: 1>, scalar_prefetch = 0 : i64, scratch_operands = 0 : i64, tpu.core_type = #tpu.core_type<tc>, window_params = [{transform_indices = @transform_0, window_bounds = array<i64: 8, 11>}, {pipeline_mode = #tpu.pipeline_mode<synchronous>, transform_indices = @transform_1, window_bounds = array<i64: 11, 128>}, {pipeline_mode = #tpu.pipeline_mode<synchronous>, transform_indices = @transform_2, window_bounds = array<i64: 1, 128>}, {pipeline_mode = #tpu.pipeline_mode<synchronous>, transform_indices = @transform_3, window_bounds = array<i64: 128, 64>}, {pipeline_mode = #tpu.pipeline_mode<synchronous>, transform_indices = @transform_4, window_bounds = array<i64: 1, 64>}, {transform_indices = @transform_5, window_bounds = array<i64: 8, 64>}]} {
    %c0 = arith.constant 0 : index
    %c0_0 = arith.constant 0 : index
    %0 = vector.load %arg1[%c0, %c0_0] : memref<8x11xf32, #tpu.memory_space<vmem>>, vector<8x11xf32>
    %c0_1 = arith.constant 0 : index
    %c0_2 = arith.constant 0 : index
    %1 = vector.load %arg2[%c0_1, %c0_2] : memref<11x128xf32, #tpu.memory_space<vmem>>, vector<11x128xf32>
    %cst = arith.constant dense<0.000000e+00> : vector<8x128xf32>
    %2 = tpu.matmul %0, %1, %cst {dimension_numbers = #tpu.dot_dimension_numbers<[1], [0], [0], [1], [0, 0, 1, 1], [], []>} : vector<8x11xf32>, vector<11x128xf32>, vector<8x128xf32> -> vector<8x128xf32>
    %c0_3 = arith.constant 0 : index
    %c0_4 = arith.constant 0 : index
    %3 = vector.load %arg3[%c0_3, %c0_4] : memref<1x128xf32, #tpu.memory_space<vmem>>, vector<1x128xf32>
    %4 = vector.broadcast %3 : vector<1x128xf32> to vector<8x128xf32>
    %5 = arith.addf %2, %4 : vector<8x128xf32>
    %cst_5 = arith.constant 0.000000e+00 : f32
    %6 = vector.broadcast %cst_5 : f32 to vector<8x128xf32>
    %7 = arith.maximumf %5, %6 : vector<8x128xf32>
    %c0_6 = arith.constant 0 : index
    %c0_7 = arith.constant 0 : index
    %8 = vector.load %arg4[%c0_6, %c0_7] : memref<128x64xf32, #tpu.memory_space<vmem>>, vector<128x64xf32>
    %cst_8 = arith.constant dense<0.000000e+00> : vector<8x64xf32>
    %9 = tpu.matmul %7, %8, %cst_8 {dimension_numbers = #tpu.dot_dimension_numbers<[1], [0], [0], [1], [0, 0, 1, 1], [], []>} : vector<8x128xf32>, vector<128x64xf32>, vector<8x64xf32> -> vector<8x64xf32>
    %c0_9 = arith.constant 0 : index
    %c0_10 = arith.constant 0 : index
    %10 = vector.load %arg5[%c0_9, %c0_10] : memref<1x64xf32, #tpu.memory_space<vmem>>, vector<1x64xf32>
    %11 = vector.broadcast %10 : vector<1x64xf32> to vector<8x64xf32>
    %12 = arith.addf %9, %11 : vector<8x64xf32>
    %13 = arith.negf %12 : vector<8x64xf32>
    %14 = math.exp %13 : vector<8x64xf32>
    %cst_11 = arith.constant 1.000000e+00 : f32
    %15 = vector.broadcast %cst_11 : f32 to vector<8x64xf32>
    %16 = arith.addf %15, %14 : vector<8x64xf32>
    %17 = arith.divf %15, %16 : vector<8x64xf32>
    %c0_12 = arith.constant 0 : index
    %c0_13 = arith.constant 0 : index
    %18 = vector.load %arg6[%c0_12, %c0_13] : memref<8x64xf32, #tpu.memory_space<vmem>>, vector<8x64xf32>
    tpu.vector_store %arg6[%c0_12, %c0_13], %17 {strides = array<i32>} : memref<8x64xf32, #tpu.memory_space<vmem>>, vector<8x64xf32>,
    return
  }
  func.func @transform_0(%arg0: i32) -> (i32, i32) {
    %c0_i32 = arith.constant 0 : i32
    %c0_i32_0 = arith.constant 0 : i32
    return %arg0, %c0_i32 : i32, i32
  }
  func.func @transform_1(%arg0: i32) -> (i32, i32) {
    %c0_i32 = arith.constant 0 : i32
    %c0_i32_0 = arith.constant 0 : i32
    %c0_i32_1 = arith.constant 0 : i32
    return %c0_i32, %c0_i32_0 : i32, i32
  }
  func.func @transform_2(%arg0: i32) -> (i32, i32) {
    %c0_i32 = arith.constant 0 : i32
    %c0_i32_0 = arith.constant 0 : i32
    %c0_i32_1 = arith.constant 0 : i32
    return %c0_i32, %c0_i32_0 : i32, i32
  }
  func.func @transform_3(%arg0: i32) -> (i32, i32) {
    %c0_i32 = arith.constant 0 : i32
    %c0_i32_0 = arith.constant 0 : i32
    %c0_i32_1 = arith.constant 0 : i32
    return %c0_i32, %c0_i32_0 : i32, i32
  }
  func.func @transform_4(%arg0: i32) -> (i32, i32) {
    %c0_i32 = arith.constant 0 : i32
    %c0_i32_0 = arith.constant 0 : i32
    %c0_i32_1 = arith.constant 0 : i32
    return %c0_i32, %c0_i32_0 : i32, i32
  }
  func.func @transform_5(%arg0: i32) -> (i32, i32) {
    %c0_i32 = arith.constant 0 : i32
    %c0_i32_0 = arith.constant 0 : i32
    return %arg0, %c0_i32 : i32, i32
  }
}

</mosaic_0001>

<bundles_post_ra>
// kernel: generator_forward.1
= control target key start
LH: loop header
LB: loop body
LE: loop exit
PB: predicated region body
PF: predicated region fallthrough
CT: control target
= control target key end

     0   :  { %vm35_vm0 = vcmask 1042432   ;;  %v353_v2 = vmov 0.0|0.0   ;;  %vm354_vm1 = vmmov 1   ;;  %vm355_vm3 = vmmov 0   ;;  %s463_s0 = inlined_call_operand.vmem [shape: f32[8,11], index: 0, kind: input, shape index: {}]   ;;  %s464_s1 = inlined_call_operand.vmem [shape: f32[11,128], index: 1, kind: input, shape index: {}]   ;;  %s465_s2 = inlined_call_operand.vmem [shape: f32[1,128], index: 2, kind: input, shape index: {}]   ;;  %s466_s3 = inlined_call_operand.vmem [shape: f32[128,64], index: 3, kind: input, shape index: {}]   ;;  %s467_s4 = inlined_call_operand.vmem [shape: f32[1,64], index: 4, kind: input, shape index: {}]   ;;  %s468_s5 = inlined_call_operand.hbm [shape: f32[8,64], index: 5, kind: output, shape index: {}]  }
   0x1   :  { %v22_v0 = vld [vmem:[%s464_s1] sm:$0xff]  ;;  %v23_v1 = vld [vmem:[%s464_s1 + $0x8] sm:$0x7]  ;;  %292 = vmatprep.subr.bf16.mxu0 %v353_v2  ;;  %vm294_vm2 = vmpackc.low %vm35_vm0, %vm354_vm1  ;;  %296 = vmatprep.subr.bf16.mxu1 %v353_v2  ;;  %v356_v5 = vmov 0.0   ;;  %vm31_vm4 = vcmask 89088  }
   0x2   :  { %v293_v3 = vpack.c.bf16 %v23_v1, %v22_v0  ;;  %v110_v4 = vld [vmem:[%s466_s3] sm:$0xff]  ;;  %254 = vmatprep.mubr.msk.f32.mxu0 %vm355_vm3, %v356_v5  ;;  %v111_v6 = vld [vmem:[%s466_s3 + $0x8] sm:$0xff]  ;;  %v112_v7 = vld [vmem:[%s466_s3 + $0x10] sm:$0xff]  ;;  %289 = vmatprep.mubr.msk.f32.mxu1 %vm355_vm3, %v356_v5 }
   0x3   :  { %v113_v8 = vld [vmem:[%s466_s3 + $0x18] sm:$0xff]  ;;  %v21_v9 = vld [vmem:[%s463_s0] sm:$0xff]  ;;  %v297_v10 = vpack.c.bf16 %v111_v6, %v110_v4  ;;  %v115_v13 = vld [vmem:[%s466_s3 + $0x28] sm:$0xff] }
   0x4   :  { %295 = vmatpush3.bf16.msk.msra.mxu0 %vm294_vm2, %v293_v3  ;;  %v300_v11 = vpack.c.bf16 %v113_v8, %v112_v7  ;;  %v114_v12 = vld [vmem:[%s466_s3 + $0x20] sm:$0xff] }
   0x5   :  { %298 = vmatpush3.bf16.msra.mxu1 %v297_v10 }
   0x6   :  { %299 = vmatprep.subr.bf16.mxu1 %v353_v2 }
   0x7   :  { %255 = vmatmul.mubr.msk.f32.vlgmr.msra.gmra.mrb[0].mxu0 %vm31_vm4, %v21_v9 }
   0x8   :  { %10 = vsyncpa [#allocation3], 0  ;;  %v303_v14 = vpack.c.bf16 %v115_v13, %v114_v12  ;;  %v116_v15 = vld [vmem:[%s466_s3 + $0x30] sm:$0xff]  ;;  %v117_v16 = vld [vmem:[%s466_s3 + $0x38] sm:$0xff]  ;;  %vm209_vm5 = vcmask 523264  }
   0x9   :  { %301 = vmatpush3.bf16.msra.mxu1 %v300_v11  ;;  %v306_v17 = vpack.c.bf16 %v117_v16, %v116_v15  ;;  %v118_v18 = vld [vmem:[%s466_s3 + $0x40] sm:$0xff]  ;;  %v119_v19 = vld [vmem:[%s466_s3 + $0x48] sm:$0xff]  ;;  %v120_v21 = vld [vmem:[%s466_s3 + $0x50] sm:$0xff] }
   0xa   :  { %302 = vmatprep.subr.bf16.mxu1 %v353_v2  ;;  %v309_v20 = vpack.c.bf16 %v119_v19, %v118_v18  ;;  %v121_v22 = vld [vmem:[%s466_s3 + $0x58] sm:$0xff]  ;;  %v122_v24 = vld [vmem:[%s466_s3 + $0x60] sm:$0xff]  ;;  %v123_v25 = vld [vmem:[%s466_s3 + $0x68] sm:$0xff] }
   0xb   :  { %v312_v23 = vpack.c.bf16 %v121_v22, %v120_v21  ;;  %v315_v26 = vpack.c.bf16 %v123_v25, %v122_v24  ;;  %v124_v27 = vld [vmem:[%s466_s3 + $0x70] sm:$0xff]  ;;  %v125_v28 = vld [vmem:[%s466_s3 + $0x78] sm:$0xff]  ;;  %v225_v30 = vld [vmem:[%s465_s2] ss:$0 sm:$0xff]  ;;  %s357_s3 = smov [#allocation2]  }
   0xc   :  { %v318_v29 = vpack.c.bf16 %v125_v28, %v124_v27  ;;  %v228_v35 = vld [vmem:[%s467_s4] ss:$0 sm:$0xff]  ;;  %s217_s7 = sshll.u32 %s357_s3, 4  ;;  %s218_s7 = int_to_ptr.vmem [resolvable:$true] %s217_s7 }
   0xd   :  { %304 = vmatpush3.bf16.msra.mxu1 %v303_v14  ;;  %s329_s2 = scalar_lea.vmem %s218_s7, 128  ;;  %p334_p1 = scmp.lt.s32.totalorder %s218_s7, %s218_s7 }
   0xe   :  { %305 = vmatprep.subr.bf16.mxu1 %v353_v2  ;;  %p330_p0 = scmp.ne.s32.totalorder %s218_s7, %s329_s2  ;;  %p335_p2 = scmp.lt.s32.totalorder %s329_s2, %s329_s2 }
  0x10   :  { %p336_p3 = por %p335_p2, %p334_p1 }
  0x11   :  { %307 = vmatpush3.bf16.msra.mxu1 %v306_v17 }
  0x12   :  { %308 = vmatprep.subr.bf16.mxu1 %v353_v2  ;;  %p337_p4 = pnand %p336_p3, %p330_p0 }
  0x15   :  { %310 = vmatpush3.bf16.msra.mxu1 %v309_v20 }
  0x16   :  { %311 = vmatprep.subr.bf16.mxu1 %v353_v2 }
  0x19   :  { %313 = vmatpush3.bf16.msra.mxu1 %v312_v23 }
  0x1a   :  { %314 = vmatprep.subr.bf16.mxu1 %v353_v2 }
  0x1d   :  { %316 = vmatpush3.bf16.msra.mxu1 %v315_v26 }
  0x1e   :  { %317 = vmatprep.subr.bf16.mxu1 %v353_v2 }
  0x21   :  { %319 = vmatpush3.bf16.msra.mxu1 %v318_v29 }
  0xda   :  { %v105_v31 = vpop.f32.mrb[0].mxu0 }
  0xdb   :  { %v106_v32 = vadd.f32 %v225_v30, %v105_v31  ;;  %v256_v33 = vpop.f32.mrb[1].mxu0 }
  0xdd   :  { %v109_v34 = vmax.f32 %v106_v32, 0.0 }
  0xdf   :  { %290 = vmatmul.mubr.f32.vlgmr.msra.gmra.mrb[0].mxu1 %v109_v34 }
 0x1b2   :  { %v199_v36 = vpop.f32.mrb[0].mxu1 }
 0x1b3   :  { %v200_v37 = vadd.f32 %v228_v35, %v199_v36  ;;  %v291_v38 = vpop.f32.mrb[1].mxu1 }
 0x1b5   :  { %v229_v39 = vmul.f32 -1.442695, %v200_v37 }
 0x1b7   :  { %325 = vpow2.f32 %v229_v39 }
 0x1c1   :  { %v326_v40 = vpop.eup %325 }
 0x1c2   :  { %v206_v41 = vadd.f32 1.0, %v326_v40 }
 0x1c4   :  { %327 = vrcp.f32 %v206_v41 }
 0x1ce   :  { %v328_v42 = vpop.eup %327 }
 0x1cf   :  { %210 = vst.msk [vmem:[#allocation2] sm:$0xff] %vm209_vm5, %v328_v42 }
 0x1d0   :  { %340 = shalt.err (!%p337_p4)
}
 0x1d1   :  { %s341_s9 = scalar_lea.hbm %s468_s5, 128 }
 0x1d2   :  { %p342_p5 = scmp.ne.s32.totalorder %s468_s5, %s341_s9  ;;  %p345_p6 = scmp.lt.u32.totalorder %s341_s9, %s468_s5 }
 0x1d4   :  { %p347_p7 = pnand %p345_p6, %p342_p5 }
 0x1d6   :  { %350 = shalt.err (!%p347_p7)
}
 0x1d7   :  { %220 = dma.vmem_to_hbm [thread:$0]  %s218_s7, 128, %s468_s5, [#allocation3]  }
 0x1d8   :  { %351 = dma.done.wait [#allocation3], 128  }
 0x1d9   :  { %352 = vsyncadd [#allocation3], 4294967168 }
 0x1da   :  { %224 = vsyncpa [#allocation3], 1 }

</bundles_post_ra>
